<compile_context>
chip_gen: v6e
topology: v6e:2x2x1
jax: 0.10.0
libtpu: 0.0.40
codegen_flags: <defaults>
</compile_context>

<pallas_src>
import jax
import jax.numpy as jnp
import numpy as np
from jax import lax
from jax.experimental import pallas as pl
from jax.experimental.pallas import tpu as pltpu

H, W = 128, 128                     # input spatial size implied by Linear(4*8*8, 11)
C_IN, C1, C2 = 3, 4, 4
POOL = 4
H1, W1 = H // POOL, W // POOL       # 32, 32
H2, W2 = H1 // POOL, W1 // POOL     # 8, 8
N_CLASSES = 11
BN_EPS = 1e-5


# --------------------------------------------------------------------------
# pltpu.roll direction probe (run once, eagerly) so the shift amounts used in
# the kernel are correct regardless of the rotate convention.
# --------------------------------------------------------------------------
_ROLL_IS_JNP = None


def _roll_probe_kernel(x_ref, o_ref):
    o_ref[...] = pltpu.roll(x_ref[...], 1, axis=1)


def _roll_matches_jnp():
    """True if pltpu.roll(x, s)[i] == x[i - s] (jnp.roll convention)."""
    global _ROLL_IS_JNP
    if _ROLL_IS_JNP is None:
        probe_in = jnp.broadcast_to(jnp.arange(128, dtype=jnp.float32), (8, 128))
        out = pl.pallas_call(
            _roll_probe_kernel,
            out_shape=jax.ShapeDtypeStruct((8, 128), jnp.float32))(probe_in)
        _ROLL_IS_JNP = bool(out[0, 1] == probe_in[0, 0])
    return _ROLL_IS_JNP


def _roll_plus(x, k, axis):
    """y[..., i, ...] = x[..., (i + k) % n, ...] along `axis` (XLU rotate)."""
    n = x.shape[axis]
    jnp_like = True if _ROLL_IS_JNP is None else _ROLL_IS_JNP
    shift = (-k) % n if jnp_like else k % n
    return pltpu.roll(x, shift, axis=axis)


# --------------------------------------------------------------------------
# glue: constant tables (0/1 selection matrices, edge masks) and BN folding
# --------------------------------------------------------------------------
def _structural_constants():
    lane = np.arange(W)
    # edge masks for the conv1 column (kw) shifts: row 0 zeroes col 0 (x[w-1]),
    # row 1 zeroes col W-1 (x[w+1]).
    cmask1 = np.stack([(lane != 0), (lane != W - 1)]).astype(np.float32)
    # pool1: pick every 4th column / row.
    selw1 = (lane[:, None] == 4 * np.arange(W1)[None, :]).astype(np.float32)      # (128, 32)
    selh1 = (np.arange(H)[None, :] == 4 * np.arange(H1)[:, None]).astype(np.float32)  # (32, 128)
    eye128 = np.eye(C1 * W1, dtype=np.float32)                                     # lane placement
    # conv2 (channel-packed) column-shift masks: zero per-channel edge columns.
    c = np.arange(C1 * W1)
    gmask2 = np.stack([(c % W1 != 0), (c % W1 != W1 - 1)]).astype(np.float32)
    # conv2 reduce-over-input-channels + place at output-channel lanes.
    gcol = np.tile(np.eye(W1, dtype=np.float32), (C1, 1))                          # (128, 32)
    gred = np.zeros((C2 * C1 * W1, C2 * W1), np.float32)                           # (512, 128)
    for co in range(C2):
        gred[co * C1 * W1:(co + 1) * C1 * W1, co * W1:(co + 1) * W1] = gcol
    # pool2 (channel-packed): pick every 4th column inside each 32-lane group.
    sw = (np.arange(W1)[:, None] == 4 * np.arange(W2)[None, :]).astype(np.float32)
    selw2 = np.zeros((C1 * W1, C2 * W2), np.float32)                               # (128, 32)
    for co in range(C2):
        selw2[co * W1:(co + 1) * W1, co * W2:(co + 1) * W2] = sw
    selh2 = (np.arange(H1)[None, :] == 4 * np.arange(H2)[:, None]).astype(np.float32)  # (8, 32)
    return cmask1, selw1, selh1, eye128, gmask2, gred, selw2, selh2


def _fold_params(params):
    (w1, b1, g1, be1, rm1, rv1,
     w2, b2, g2, be2, rm2, rv2, wfc, bfc) = params
    # eval-mode BatchNorm folded into conv weights / bias.
    s1 = g1 / jnp.sqrt(rv1 + BN_EPS)
    b1f = (b1 - rm1) * s1 + be1
    w1s = (w1 * s1[:, None, None, None]).reshape(-1)            # (C1*C_IN*9,)
    s2 = g2 / jnp.sqrt(rv2 + BN_EPS)
    b2f = (b2 - rm2) * s2 + be2
    w2f = w2 * s2[:, None, None, None]
    # conv2 weights as per-(co,kh,kw) lane rows broadcast over the 4 packed
    # input channels: w2rows[co*9+kh*3+kw, ci*32+w] = w2f[co, ci, kh, kw].
    w2rows = jnp.repeat(jnp.transpose(w2f, (0, 2, 3, 1)).reshape(C2 * 9, C1),
                        W1, axis=1)                             # (36, 128)
    b2row = jnp.repeat(b2f, W1)[None, :]                        # (1, 128)
    # FC weights reordered to the (h, co, w) feature packing used in-kernel:
    # vfc[h*32 + co*8 + j, n] = wfc[n, co*64 + h*8 + j]  (torch flatten order).
    vfc = jnp.transpose(wfc.reshape(N_CLASSES, C2, H2, W2),
                        (2, 1, 3, 0)).reshape(H2 * C2 * W2, N_CLASSES)
    bfc_row = bfc[None, :]                                      # (1, 11)
    return w1s, b1f, w2rows, b2row, vfc, bfc_row


# --------------------------------------------------------------------------
# the fused kernel
# --------------------------------------------------------------------------
def _hw3_fused_kernel(x_ref, w1s_ref, b1s_ref, cmask1_ref, selw1_ref, selh1_ref,
                      eye_ref, gmask2_ref, w2rows_ref, b2row_ref, gred_ref,
                      selw2_ref, selh2_ref, vfc_ref, bfcr_ref,
                      out_ref, cs1_ref, cs2_ref):
    f32 = jnp.float32
    nb = x_ref.shape[0]

    # Zero only the 8-row sublane halos of the staging buffers (never written
    # by per-image data); the data rows are fully overwritten each image.
    zrow1 = jnp.zeros((8, W), f32)
    for s in range(3 * C_IN):
        cs1_ref[s, 0:8, :] = zrow1
        cs1_ref[s, 8 + H:16 + H, :] = zrow1
    zrow2 = jnp.zeros((8, C1 * W1), f32)
    for s in range(3):
        cs2_ref[s, 0:8, :] = zrow2
        cs2_ref[s, 8 + H1:16 + H1, :] = zrow2

    for img in range(nb):
        # ---- stage lane-shifted input copies (conv1 kw taps), row halo ----
        for ci in range(C_IN):
            xc = x_ref[img, ci]                                       # (H, W)
            cs1_ref[ci * 3 + 1, 8:8 + H, :] = xc                      # x[w]
            cs1_ref[ci * 3 + 0, 8:8 + H, :] = (
                _roll_plus(xc, -1, 1) * cmask1_ref[0:1, :])           # x[w-1]
            cs1_ref[ci * 3 + 2, 8:8 + H, :] = (
                _roll_plus(xc, 1, 1) * cmask1_ref[1:2, :])            # x[w+1]

        # ---- conv1 (+folded BN) + ReLU + MaxPool(4), one out channel at a
        #      time so only one 16-vreg accumulator is live -----------------
        p1pack = jnp.zeros((H1, C1 * W1), f32)                        # packed pool1
        for co in range(C1):
            acc = jnp.zeros((H, W), f32) + b1s_ref[co]
            for ci in range(C_IN):
                for kw in range(3):
                    base = ci * 3 + kw
                    for kh in range(3):
                        patch = cs1_ref[base, 7 + kh:7 + kh + H, :]   # sublane-offset read
                        acc = acc + patch * w1s_ref[((co * C_IN + ci) * 3 + kh) * 3 + kw]
            acc = jnp.maximum(acc, 0.0)
            # separable 4x4 max-pool: W-max (XLU rolls) -> column-select
            # matmul -> H-max -> row-select matmul.
            t = jnp.maximum(jnp.maximum(acc, _roll_plus(acc, 1, 1)),
                            jnp.maximum(_roll_plus(acc, 2, 1), _roll_plus(acc, 3, 1)))
            csel = jnp.dot(t, selw1_ref[...], preferred_element_type=f32)     # (H, 32)
            u = jnp.maximum(jnp.maximum(csel, _roll_plus(csel, 1, 0)),
                            jnp.maximum(_roll_plus(csel, 2, 0), _roll_plus(csel, 3, 0)))
            p = jnp.dot(selh1_ref[...], u, preferred_element_type=f32)        # (32, 32)
            # place channel co at lanes [co*32, (co+1)*32)
            p1pack = p1pack + jnp.dot(p, eye_ref[co * W1:(co + 1) * W1, :],
                                      preferred_element_type=f32)

        # ---- stage lane-shifted copies of packed pool1 (conv2 kw taps) ----
        cs2_ref[1, 8:8 + H1, :] = p1pack
        cs2_ref[0, 8:8 + H1, :] = _roll_plus(p1pack, -1, 1) * gmask2_ref[0:1, :]
        cs2_ref[2, 8:8 + H1, :] = _roll_plus(p1pack, 1, 1) * gmask2_ref[1:2, :]

        # ---- conv2 (+folded BN) + ReLU with channels packed along lanes ---
        a2 = jnp.zeros((H1, C2 * W1), f32)
        for co in range(C2):
            acc2 = jnp.zeros((H1, C1 * W1), f32)
            for kw in range(3):
                for kh in range(3):
                    ridx = co * 9 + kh * 3 + kw
                    acc2 = acc2 + (cs2_ref[kw, 7 + kh:7 + kh + H1, :]
                                   * w2rows_ref[ridx:ridx + 1, :])
            # reduce over the 4 packed input channels and place at co's lanes
            a2 = a2 + jnp.dot(acc2, gred_ref[co * C1 * W1:(co + 1) * C1 * W1, :],
                              preferred_element_type=f32)
        a2 = jnp.maximum(a2 + b2row_ref[...], 0.0)

        # ---- MaxPool(4) (separable, packed) -> features (8, 32) -----------
        t2 = jnp.maximum(jnp.maximum(a2, _roll_plus(a2, 1, 1)),
                         jnp.maximum(_roll_plus(a2, 2, 1), _roll_plus(a2, 3, 1)))
        r2 = jnp.dot(t2, selw2_ref[...], preferred_element_type=f32)          # (32, 32)
        u2 = jnp.maximum(jnp.maximum(r2, _roll_plus(r2, 1, 0)),
                         jnp.maximum(_roll_plus(r2, 2, 0), _roll_plus(r2, 3, 0)))
        feat = jnp.dot(selh2_ref[...], u2, preferred_element_type=f32)        # (8, 32)

        # ---- fused Linear(256, 11): contract the 8 feature rows ------------
        lg = bfcr_ref[...]                                                    # (1, 11)
        for h in range(H2):
            lg = lg + jnp.dot(feat[h:h + 1, :],
                              vfc_ref[h * (C2 * W2):(h + 1) * (C2 * W2), :],
                              preferred_element_type=f32)
        out_ref[img] = lg


# --------------------------------------------------------------------------
# wrapper
# --------------------------------------------------------------------------
def _pick_block_batch(batch):
    if batch <= 8:
        return batch
    for nb in range(8, 0, -1):
        if batch % nb == 0:
            return nb
    return 1


def hw3_mini_classifier_forward(x, params):
    B = x.shape[0]
    assert x.shape[1:] == (C_IN, H, W), x.shape
    _roll_matches_jnp()   # resolve the pltpu.roll convention before tracing

    w1s, b1f, w2rows, b2row, vfc, bfc_row = _fold_params(params)
    (cmask1, selw1, selh1, eye128,
     gmask2, gred, selw2, selh2) = _structural_constants()

    nb = _pick_block_batch(B)
    grid = (B // nb,)

    smem_spec = pl.BlockSpec(memory_space=pltpu.MemorySpace.SMEM)

    def _const(shape):
        n = len(shape)
        return pl.BlockSpec(shape, lambda i: (0,) * n)

    out = pl.pallas_call(
        _hw3_fused_kernel,
        out_shape=jax.ShapeDtypeStruct((B, 1, N_CLASSES), jnp.float32),
        grid_spec=pltpu.PrefetchScalarGridSpec(
            num_scalar_prefetch=0,
            grid=grid,
            in_specs=[
                pl.BlockSpec((nb, C_IN, H, W), lambda i: (i, 0, 0, 0)),
                smem_spec,                      # w1s (folded conv1 weights)
                smem_spec,                      # b1f (folded conv1 bias)
                _const(cmask1.shape),
                _const(selw1.shape),
                _const(selh1.shape),
                _const(eye128.shape),
                _const(gmask2.shape),
                _const(w2rows.shape),
                _const(b2row.shape),
                _const(gred.shape),
                _const(selw2.shape),
                _const(selh2.shape),
                _const(vfc.shape),
                _const(bfc_row.shape),
            ],
            out_specs=pl.BlockSpec((nb, 1, N_CLASSES), lambda i: (i, 0, 0)),
            scratch_shapes=[
                pltpu.VMEM((3 * C_IN, H + 16, W), jnp.float32),    # conv1 kw taps (+row halo)
                pltpu.VMEM((3, H1 + 16, C1 * W1), jnp.float32),    # conv2 kw taps (+row halo)
            ]),
        compiler_params=pltpu.CompilerParams(
            dimension_semantics=("parallel",)),
    )(x, w1s, b1f, cmask1, selw1, selh1, eye128, gmask2,
      w2rows, b2row, gred, selw2, selh2, vfc, bfc_row)
    return out.reshape(B, N_CLASSES)


# --------------------------------------------------------------------------
# pure-JAX reference (eval-mode BN) for the numerical check
# --------------------------------------------------------------------------
def reference_forward(x, params):
    (w1, b1, g1, be1, rm1, rv1,
     w2, b2, g2, be2, rm2, rv2, wfc, bfc) = params

    def block(z, w, b, g, be, rm, rv):
        y = lax.conv_general_dilated(
            z, w, (1, 1), ((1, 1), (1, 1)),
            dimension_numbers=("NCHW", "OIHW", "NCHW"),
            precision=lax.Precision.HIGHEST)
        y = y + b[None, :, None, None]
        y = ((y - rm[None, :, None, None])
             / jnp.sqrt(rv + BN_EPS)[None, :, None, None]
             * g[None, :, None, None] + be[None, :, None, None])
        y = jnp.maximum(y, 0.0)
        y = lax.reduce_window(y, -jnp.inf, lax.max,
                              (1, 1, POOL, POOL), (1, 1, POOL, POOL), "VALID")
        return y

    y = block(x, w1, b1, g1, be1, rm1, rv1)
    y = block(y, w2, b2, g2, be2, rm2, rv2)
    y = y.reshape(y.shape[0], -1)
    return jnp.dot(y, wfc.T, precision=lax.Precision.HIGHEST) + bfc


if __name__ == "__main__":
    key = jax.random.PRNGKey(0)
    ks = jax.random.split(key, 8)
    B = 2
    # Input spatial size must be 128x128 so two MaxPool(4) stages give the
    # 4*8*8 = 256 features expected by the Linear layer.
    x = jax.random.normal(ks[0], (B, C_IN, H, W), jnp.float32)

    w1 = 0.2 * jax.random.normal(ks[1], (C1, C_IN, 3, 3), jnp.float32)
    b1 = 0.1 * jax.random.normal(ks[2], (C1,), jnp.float32)
    g1, be1 = jnp.ones((C1,), jnp.float32), jnp.zeros((C1,), jnp.float32)
    rm1, rv1 = jnp.zeros((C1,), jnp.float32), jnp.ones((C1,), jnp.float32)

    w2 = 0.2 * jax.random.normal(ks[3], (C2, C1, 3, 3), jnp.float32)
    b2 = 0.1 * jax.random.normal(ks[4], (C2,), jnp.float32)
    g2, be2 = jnp.ones((C2,), jnp.float32), jnp.zeros((C2,), jnp.float32)
    rm2, rv2 = jnp.zeros((C2,), jnp.float32), jnp.ones((C2,), jnp.float32)

    wfc = 0.05 * jax.random.normal(ks[5], (N_CLASSES, C2 * H2 * W2), jnp.float32)
    bfc = 0.1 * jax.random.normal(ks[6], (N_CLASSES,), jnp.float32)

    params = (w1, b1, g1, be1, rm1, rv1,
              w2, b2, g2, be2, rm2, rv2, wfc, bfc)

    logits = hw3_mini_classifier_forward(x, params)
    jax.block_until_ready(logits)
    assert logits.shape == (B, N_CLASSES)

    ref = reference_forward(x, params)
    np.testing.assert_allclose(np.asarray(logits), np.asarray(ref),
                               rtol=2e-3, atol=2e-3)
    print("KERNEL_OK")
</pallas_src>

<mosaic_0001>
module attributes {stable_mosaic.version = 11 : i64} {
  func.func @_roll_probe_kernel(%arg0: memref<8x128xf32, #tpu.memory_space<vmem>>, %arg1: memref<8x128xf32, #tpu.memory_space<vmem>>) attributes {dimension_semantics = [], scalar_prefetch = 0 : i64, scratch_operands = 0 : i64, tpu.core_type = #tpu.core_type<tc>} {
    %c0 = arith.constant 0 : index
    %c0_0 = arith.constant 0 : index
    %0 = vector.load %arg0[%c0, %c0_0] : memref<8x128xf32, #tpu.memory_space<vmem>>, vector<8x128xf32>
    %c1_i32 = arith.constant 1 : i32
    %1 = tpu.dynamic_rotate %0 by %c1_i32 dim 1 : vector<8x128xf32>, i32 -> vector<8x128xf32>
    %c0_1 = arith.constant 0 : index
    %c0_2 = arith.constant 0 : index
    %2 = vector.load %arg1[%c0_1, %c0_2] : memref<8x128xf32, #tpu.memory_space<vmem>>, vector<8x128xf32>
    tpu.vector_store %arg1[%c0_1, %c0_2], %1 {strides = array<i32>} : memref<8x128xf32, #tpu.memory_space<vmem>>, vector<8x128xf32>,
    return
  }
}

</mosaic_0001>

<bundles_post_ra>
// kernel: tpu_custom_call.1
= control target key start
LH: loop header
LB: loop body
LE: loop exit
PB: predicated region body
PF: predicated region fallthrough
CT: control target
= control target key end

     0   :  { %6 = vsyncpa [#allocation3], 0  ;;  %s106_s0 = inlined_call_operand.hbm [shape: f32[8,128], index: 0, kind: input, shape index: {}]   ;;  %s107_s1 = inlined_call_operand.hbm [shape: f32[8,128], index: 1, kind: output, shape index: {}]  }
   0x1   :  { %7 = vsyncpa [#allocation4], 0  ;;  %s87_s6 = smov [#allocation2]  }
   0x2   :  { %s14_s7 = sshll.u32 %s87_s6, 4  ;;  %s15_s7 = int_to_ptr.vmem [resolvable:$true] %s14_s7 }
   0x3   :  { %s51_s8 = scalar_lea.vmem %s15_s7, 128  ;;  %p56_p1 = scmp.lt.s32.totalorder %s15_s7, %s15_s7 }
   0x4   :  { %p52_p0 = scmp.ne.s32.totalorder %s15_s7, %s51_s8  ;;  %p57_p2 = scmp.lt.s32.totalorder %s51_s8, %s51_s8 }
   0x6   :  { %p58_p3 = por %p57_p2, %p56_p1 }
   0x8   :  { %p59_p4 = pnand %p58_p3, %p52_p0 }
   0xa   :  { %62 = shalt.err (!%p59_p4)
}
   0xb   :  { %17 = dma.hbm_to_vmem [thread:$0]  %s106_s0, 128, %s15_s7, [#allocation3]  }
   0xc   :  { %83 = dma.done.wait [#allocation3], 128  }
   0xd   :  { %84 = vsyncadd [#allocation3], 4294967168  ;;  %v21_v0 = vld [vmem:[#allocation2] sm:$0xff]  ;;  %s88_s11 = smov 1   ;;  %s89_s12 = smov [#allocation5]  }
   0xe   :  { %22 = vrot.lane.b32.xlu0 %v21_v0, %s88_s11  ;;  %s31_s13 = sshll.u32 %s89_s12, 4  ;;  %s32_s13 = int_to_ptr.vmem [resolvable:$true] %s31_s13 }
   0xf   :  { %s63_s14 = scalar_lea.vmem %s32_s13, 128  ;;  %p68_p6 = scmp.lt.s32.totalorder %s32_s13, %s32_s13 }
  0x10   :  { %p64_p5 = scmp.ne.s32.totalorder %s32_s13, %s63_s14  ;;  %p69_p7 = scmp.lt.s32.totalorder %s63_s14, %s63_s14 }
  0x12   :  { %p70_p8 = por %p69_p7, %p68_p6 }
  0x14   :  { %p71_p9 = pnand %p70_p8, %p64_p5 }
  0x80   :  { %v23_v1 = vpop.permute.xlu0 %22 }
  0x81   :  { %24 = vst [vmem:[#allocation5] sm:$0xff] %v23_v1 }
  0x82   :  { %74 = shalt.err (!%p71_p9)
}
  0x83   :  { %34 = dma.vmem_to_hbm [thread:$0]  %s32_s13, 128, %s107_s1, [#allocation4]  }
  0x84   :  { %85 = dma.done.wait [#allocation4], 128  }
  0x85   :  { %86 = vsyncadd [#allocation4], 4294967168 }
  0x86   :  { %38 = vsyncpa [#allocation3], 1 }
  0x87   :  { %39 = vsyncpa [#allocation4], 1 }

</bundles_post_ra>
